<compile_context>
chip_gen: v7x
topology: tpu7x:2x2x1
jax: 0.10.0
libtpu: 0.0.40
codegen_flags: <defaults>
</compile_context>

<pallas_src>
import jax
import jax.numpy as jnp
from jax import lax
from jax.experimental import pallas as pl
from jax.experimental.pallas import tpu as pltpu


_TILE_BYTES = 2 * 1024 * 1024     # target bytes per streamed input block
_MIN_TILE_BYTES = 256 * 1024      # below this, per-step overhead dominates


def _round_up(v, m):
    return ((v + m - 1) // m) * m


def _tc_splits():
    """2 on multi-TensorCore ('megacore') chips (v4 / v5p / v7x), else 1."""
    try:
        kind = jax.devices()[0].device_kind.lower()
    except Exception:
        return 1
    if any(tag in kind for tag in ("v7", "v4", "v5p")):
        return 2
    return 1


def _largest_divisor_tile(n_rows, chunk, max_tile_rows):
    """Largest tile (multiple of chunk, <= max_tile_rows) dividing n_rows, or None."""
    if n_rows % chunk:
        return None
    m = n_rows // chunk
    for d in range(min(m, max(1, max_tile_rows // chunk)), 0, -1):
        if m % d == 0:
            return d * chunk
    return None


def _choose_tiling(rows, lanes, itemsize, chunk, tc_splits):
    """Return (splits, tile_rows, steps, extra_rows) with splits*steps*tile_rows == rows+extra_rows."""
    max_tile = max(chunk, (_TILE_BYTES // (lanes * itemsize)) // chunk * chunk)
    min_rows = max(chunk, _MIN_TILE_BYTES // (lanes * itemsize))

    # (a) 2-way TensorCore split with exact tiling (no padding).
    if tc_splits == 2 and rows % 2 == 0:
        t = _largest_divisor_tile(rows // 2, chunk, max_tile)
        if t is not None and (t >= min_rows or t == rows // 2):
            return 2, t, (rows // 2) // t, 0
    # (b) whole image in a single full-dim block (no divisibility constraint).
    if rows <= max_tile:
        return 1, rows, 1, 0
    # (c) single-split exact tiling (no padding).
    t = _largest_divisor_tile(rows, chunk, max_tile)
    if t is not None and t >= min_rows:
        return 1, t, rows // t, 0
    # (d) rare fallback for pathological row counts: pad so max-size tiles divide.
    splits = 2 if tc_splits == 2 else 1
    rows_p = _round_up(rows, splits * max_tile)
    return splits, max_tile, rows_p // (splits * max_tile), rows_p - rows


def _make_vqvae_kernel(lanes, tile_rows, chunk):
    n_full = tile_rows // chunk
    rem = tile_rows - n_full * chunk
    groups = chunk // 8

    def kernel(scale_ref, x_ref, r_ref, ze_ref, zq_ref, out_ref):
        core = pl.program_id(0)
        step = pl.program_id(1)

        # out_ref's block index depends only on the core axis -> resident across
        # the (arbitrary) step axis: zero it once, accumulate every step.
        @pl.when(step == 0)
        def _init():
            out_ref[...] = jnp.zeros_like(out_ref)

        # Latent squared-error term, computed exactly once (core 0, step 0).
        @pl.when((core == 0) & (step == 0))
        def _latent():
            d = ze_ref[...].astype(jnp.float32) - zq_ref[...].astype(jnp.float32)
            sq = d * d
            g8 = sq.shape[0] // 8
            # scale = 1 + beta  (L_embed + beta * L_encoder, identical forward value)
            out_ref[...] += scale_ref[0] * jnp.sum(sq.reshape(g8, 8, lanes), axis=0)

        def _bce(xv, rv):
            xv = xv.astype(jnp.float32)
            rv = rv.astype(jnp.float32)
            # PyTorch BCELoss clamps each log term at -100.
            log_r = jnp.maximum(jnp.log(rv), -100.0)
            log_1mr = jnp.maximum(jnp.log(1.0 - rv), -100.0)
            # x*log(r) + (1-x)*log(1-r) == x*(log r - log(1-r)) + log(1-r)
            return -(xv * (log_r - log_1mr) + log_1mr)

        # BCE over this image tile: chunked accumulation in vregs keeps live
        # ranges bounded (no multi-MiB per-tile temp).
        if n_full > 0:
            def body(c, acc):
                r0 = pl.multiple_of(c * chunk, chunk)
                b = _bce(x_ref[pl.ds(r0, chunk), :], r_ref[pl.ds(r0, chunk), :])
                for g in range(groups):  # fold sub-32-bit packing back to 8-row groups
                    acc = acc + b[g * 8:(g + 1) * 8, :]
                return acc

            acc = lax.fori_loop(0, n_full, body,
                                jnp.zeros((8, lanes), jnp.float32),
                                unroll=min(4, n_full))
            out_ref[...] += acc

        # Static remainder (only in the single full-dim-block case).
        if rem > 0:
            b = _bce(x_ref[pl.ds(n_full * chunk, rem), :],
                     r_ref[pl.ds(n_full * chunk, rem), :])
            out_ref[0:1, :] += jnp.sum(b, axis=0, keepdims=True)

    return kernel


def vqvae_loss(x, recons, z_e, z_q, *unused, beta=0.1):
    """Pallas implementation of VQVAELoss.forward (returns a scalar)."""
    del unused
    n_img = int(x.size)
    n_lat = int(z_e.size)

    # Lane width: largest of 512/256/128 that divides the element count (so the
    # flatten->2-D reshape is a free bitcast); otherwise fall back to 512 + pad.
    lanes = 512
    for cand in (512, 256, 128):
        if n_img % cand == 0:
            lanes = cand
            break

    img_itemsize = max(x.dtype.itemsize, recons.dtype.itemsize)
    chunk = max(8, 32 // min(x.dtype.itemsize, recons.dtype.itemsize))  # 8/16/32 rows

    rows = max(1, -(-n_img // lanes))
    splits, tile_rows, steps, extra_rows = _choose_tiling(
        rows, lanes, img_itemsize, chunk, _tc_splits())
    rows_p = rows + extra_rows
    assert splits * steps * tile_rows == rows_p

    # Flatten images; pad only when unavoidable (zeros contribute 0 to the
    # clamped BCE sum: x=0, r=0 -> -(0*(-100-0)+0) = 0).
    total = rows_p * lanes
    if total != n_img:
        xf = jnp.pad(x.reshape(-1), (0, total - n_img))
        rf = jnp.pad(recons.reshape(-1), (0, total - n_img))
    else:
        xf = x.reshape(-1)
        rf = recons.reshape(-1)
    x2 = xf.reshape(rows_p, lanes)
    r2 = rf.reshape(rows_p, lanes)

    # Latents: tiny vs. images -> whole-array VMEM resident; padded (trivial
    # copy) to a sublane-packed row multiple. Zeros contribute 0 to the MSE sum.
    lat_pack = max(8, 32 // min(z_e.dtype.itemsize, z_q.dtype.itemsize))
    lat_rows = _round_up(max(1, -(-n_lat // lanes)), lat_pack)
    lat_total = lat_rows * lanes

    def _lat_slab(a):
        flat = a.reshape(-1)
        if lat_total != n_lat:
            flat = jnp.pad(flat, (0, lat_total - n_lat))
        return flat.reshape(lat_rows, lanes)

    ze2 = _lat_slab(z_e)
    zq2 = _lat_slab(z_q)

    # (1 + beta) as an SMEM scalar -> single compiled kernel for any beta.
    scale = jnp.asarray([1.0 + float(beta)], dtype=jnp.float32)

    img_spec = pl.BlockSpec((tile_rows, lanes), lambda i, j, s: (i * steps + j, 0))
    lat_spec = pl.BlockSpec((lat_rows, lanes), lambda i, j, s: (0, 0))
    out_spec = pl.BlockSpec((8, lanes), lambda i, j, s: (i, 0))

    bytes_accessed = int(x2.size * x2.dtype.itemsize + r2.size * r2.dtype.itemsize
                         + ze2.size * ze2.dtype.itemsize + zq2.size * zq2.dtype.itemsize)
    cost = pl.CostEstimate(
        flops=int(6 * n_img + 4 * n_lat),
        transcendentals=int(2 * n_img),
        bytes_accessed=bytes_accessed,
    )

    partials = pl.pallas_call(
        _make_vqvae_kernel(lanes, tile_rows, chunk),
        out_shape=jax.ShapeDtypeStruct((splits * 8, lanes), jnp.float32),
        grid_spec=pltpu.PrefetchScalarGridSpec(
            num_scalar_prefetch=1,
            grid=(splits, steps),
            in_specs=[img_spec, img_spec, lat_spec, lat_spec],
            out_specs=out_spec,
        ),
        compiler_params=pltpu.CompilerParams(
            dimension_semantics=("parallel", "arbitrary"),
            vmem_limit_bytes=32 * 1024 * 1024,
        ),
        cost_estimate=cost,
    )(scale, x2, r2, ze2, zq2)

    # Tiny final cross-lane reduce of the per-core partial slabs.
    return jnp.sum(partials)


def _reference_loss(x, recons, z_e, z_q, beta=0.1):
    """Pure-JAX reference mirroring the PyTorch forward."""
    log_r = jnp.maximum(jnp.log(recons), -100.0)
    log_1mr = jnp.maximum(jnp.log(1.0 - recons), -100.0)
    L_recons = -jnp.sum(x * log_r + (1.0 - x) * log_1mr)
    L_embed = jnp.sum((z_e - z_q) ** 2)
    L_encoder = jnp.sum((z_e - z_q) ** 2)
    return L_recons + L_embed + beta * L_encoder


if __name__ == "__main__":
    key = jax.random.PRNGKey(0)
    k1, k2, k3, k4 = jax.random.split(key, 4)

    # Small shapes consistent with a VQ-VAE forward:
    #   x, recons : image / reconstruction, NCHW, values in (0, 1) for BCE
    #   z_e, z_q  : encoder output and quantized codes, NCHW latent
    B, C, H, W = 2, 4, 16, 16
    D, h, w = 8, 4, 4

    x = jax.random.uniform(k1, (B, C, H, W), dtype=jnp.float32)
    recons = jax.nn.sigmoid(jax.random.normal(k2, (B, C, H, W), dtype=jnp.float32))
    z_e = jax.random.normal(k3, (B, D, h, w), dtype=jnp.float32)
    z_q = jax.random.normal(k4, (B, D, h, w), dtype=jnp.float32)

    loss = vqvae_loss(x, recons, z_e, z_q, beta=0.1)
    loss = jax.block_until_ready(loss)

    ref = _reference_loss(x, recons, z_e, z_q, beta=0.1)
    assert jnp.allclose(loss, ref, rtol=1e-4, atol=1e-2), (loss, ref)

    print("KERNEL_OK")
</pallas_src>

<mosaic_0001>
module attributes {stable_mosaic.version = 11 : i64} {
  func.func @kernel(%arg0: i32, %arg1: i32, %arg2: memref<1xf32, #tpu.memory_space<smem>>, %arg3: memref<4x512xf32, #tpu.memory_space<vmem>>, %arg4: memref<4x512xf32, #tpu.memory_space<vmem>>, %arg5: memref<8x512xf32, #tpu.memory_space<vmem>>, %arg6: memref<8x512xf32, #tpu.memory_space<vmem>>, %arg7: memref<8x512xf32, #tpu.memory_space<vmem>>) attributes {dimension_semantics = [#tpu.dimension_semantics<parallel>, #tpu.dimension_semantics<arbitrary>], iteration_bounds = array<i64: 1, 1>, scalar_prefetch = 1 : i64, scratch_operands = 0 : i64, tpu.core_type = #tpu.core_type<tc>, window_params = [{transform_indices = @transform_0, window_bounds = array<i64: 4, 512>}, {transform_indices = @transform_1, window_bounds = array<i64: 4, 512>}, {pipeline_mode = #tpu.pipeline_mode<synchronous>, transform_indices = @transform_2, window_bounds = array<i64: 8, 512>}, {pipeline_mode = #tpu.pipeline_mode<synchronous>, transform_indices = @transform_3, window_bounds = array<i64: 8, 512>}, {transform_indices = @transform_4, window_bounds = array<i64: 8, 512>}]} {
    %c0_i32 = arith.constant 0 : i32
    %0 = arith.cmpi eq, %arg1, %c0_i32 : i32
    %1 = arith.extui %0 : i1 to i32
    %c0_i32_0 = arith.constant 0 : i32
    %2 = arith.cmpi ne, %1, %c0_i32_0 : i32
    scf.if %2 {
      %cst_15 = arith.constant 0.000000e+00 : f32
      %28 = vector.broadcast %cst_15 : f32 to vector<8x512xf32>
      %c0_16 = arith.constant 0 : index
      %c0_17 = arith.constant 0 : index
      %29 = vector.load %arg7[%c0_16, %c0_17] : memref<8x512xf32, #tpu.memory_space<vmem>>, vector<8x512xf32>
      tpu.vector_store %arg7[%c0_16, %c0_17], %28 {strides = array<i32>} : memref<8x512xf32, #tpu.memory_space<vmem>>, vector<8x512xf32>,
    } else {
    }
    %c0_i32_1 = arith.constant 0 : i32
    %3 = arith.cmpi eq, %arg0, %c0_i32_1 : i32
    %c0_i32_2 = arith.constant 0 : i32
    %4 = arith.cmpi eq, %arg1, %c0_i32_2 : i32
    %5 = arith.andi %3, %4 : i1
    %6 = arith.extui %5 : i1 to i32
    %c0_i32_3 = arith.constant 0 : i32
    %7 = arith.cmpi ne, %6, %c0_i32_3 : i32
    scf.if %7 {
      %c0_15 = arith.constant 0 : index
      %c0_16 = arith.constant 0 : index
      %28 = vector.load %arg5[%c0_15, %c0_16] : memref<8x512xf32, #tpu.memory_space<vmem>>, vector<8x512xf32>
      %c0_17 = arith.constant 0 : index
      %c0_18 = arith.constant 0 : index
      %29 = vector.load %arg6[%c0_17, %c0_18] : memref<8x512xf32, #tpu.memory_space<vmem>>, vector<8x512xf32>
      %30 = arith.subf %28, %29 : vector<8x512xf32>
      %31 = arith.mulf %30, %30 : vector<8x512xf32>
      %c0_19 = arith.constant 0 : index
      %c0_20 = arith.constant 0 : index
      %32 = vector.load %arg7[%c0_19, %c0_20] : memref<8x512xf32, #tpu.memory_space<vmem>>, vector<8x512xf32>
      %c0_21 = arith.constant 0 : index
      %33 = memref.load %arg2[%c0_21] : memref<1xf32, #tpu.memory_space<smem>>
      %34 = vector.shape_cast %31 : vector<8x512xf32> to vector<1x8x512xf32>
      %cst_22 = arith.constant dense<0.000000e+00> : vector<8x512xf32>
      %35 = vector.multi_reduction <add>, %34, %cst_22 [0] : vector<1x8x512xf32> to vector<8x512xf32>
      %36 = vector.broadcast %33 : f32 to vector<8x512xf32>
      %37 = arith.mulf %36, %35 : vector<8x512xf32>
      %38 = arith.addf %32, %37 : vector<8x512xf32>
      %c0_23 = arith.constant 0 : index
      %c0_24 = arith.constant 0 : index
      %39 = vector.load %arg7[%c0_23, %c0_24] : memref<8x512xf32, #tpu.memory_space<vmem>>, vector<8x512xf32>
      tpu.vector_store %arg7[%c0_23, %c0_24], %38 {strides = array<i32>} : memref<8x512xf32, #tpu.memory_space<vmem>>, vector<8x512xf32>,
    } else {
    }
    %c0 = arith.constant 0 : index
    %c0_4 = arith.constant 0 : index
    %8 = vector.load %arg3[%c0, %c0_4] : memref<4x512xf32, #tpu.memory_space<vmem>>, vector<4x512xf32>
    %c0_5 = arith.constant 0 : index
    %c0_6 = arith.constant 0 : index
    %9 = vector.load %arg4[%c0_5, %c0_6] : memref<4x512xf32, #tpu.memory_space<vmem>>, vector<4x512xf32>
    %10 = math.log %9 : vector<4x512xf32>
    %cst = arith.constant -1.000000e+02 : f32
    %11 = vector.broadcast %cst : f32 to vector<4x512xf32>
    %12 = arith.maximumf %10, %11 : vector<4x512xf32>
    %cst_7 = arith.constant 1.000000e+00 : f32
    %13 = vector.broadcast %cst_7 : f32 to vector<4x512xf32>
    %14 = arith.subf %13, %9 : vector<4x512xf32>
    %15 = math.log %14 : vector<4x512xf32>
    %cst_8 = arith.constant -1.000000e+02 : f32
    %16 = vector.broadcast %cst_8 : f32 to vector<4x512xf32>
    %17 = arith.maximumf %15, %16 : vector<4x512xf32>
    %18 = arith.subf %12, %17 : vector<4x512xf32>
    %19 = arith.mulf %8, %18 : vector<4x512xf32>
    %20 = arith.addf %19, %17 : vector<4x512xf32>
    %cst_9 = arith.constant 0.000000e+00 : f32
    %21 = vector.broadcast %cst_9 : f32 to vector<4x512xf32>
    %22 = arith.subf %21, %20 : vector<4x512xf32>
    %c0_10 = arith.constant 0 : index
    %c0_11 = arith.constant 0 : index
    %23 = vector.load %arg7[%c0_10, %c0_11] : memref<8x512xf32, #tpu.memory_space<vmem>>, vector<1x512xf32>
    %cst_12 = arith.constant dense<0.000000e+00> : vector<512xf32>
    %24 = vector.multi_reduction <add>, %22, %cst_12 [0] : vector<4x512xf32> to vector<512xf32>
    %25 = vector.shape_cast %24 : vector<512xf32> to vector<1x512xf32>
    %26 = arith.addf %23, %25 : vector<1x512xf32>
    %c0_13 = arith.constant 0 : index
    %c0_14 = arith.constant 0 : index
    %27 = vector.load %arg7[%c0_13, %c0_14] : memref<8x512xf32, #tpu.memory_space<vmem>>, vector<1x512xf32>
    tpu.vector_store %arg7[%c0_13, %c0_14], %26 {strides = array<i32>} : memref<8x512xf32, #tpu.memory_space<vmem>>, vector<1x512xf32>,
    return
  }
  func.func @transform_0(%arg0: i32, %arg1: i32, %arg2: memref<1xf32, #tpu.memory_space<smem>>) -> (i32, i32) {
    %c1_i32 = arith.constant 1 : i32
    %0 = arith.muli %arg0, %c1_i32 : i32
    %1 = arith.addi %0, %arg1 : i32
    %c0_i32 = arith.constant 0 : i32
    %c0_i32_0 = arith.constant 0 : i32
    return %1, %c0_i32 : i32, i32
  }
  func.func @transform_1(%arg0: i32, %arg1: i32, %arg2: memref<1xf32, #tpu.memory_space<smem>>) -> (i32, i32) {
    %c1_i32 = arith.constant 1 : i32
    %0 = arith.muli %arg0, %c1_i32 : i32
    %1 = arith.addi %0, %arg1 : i32
    %c0_i32 = arith.constant 0 : i32
    %c0_i32_0 = arith.constant 0 : i32
    return %1, %c0_i32 : i32, i32
  }
  func.func @transform_2(%arg0: i32, %arg1: i32, %arg2: memref<1xf32, #tpu.memory_space<smem>>) -> (i32, i32) {
    %c0_i32 = arith.constant 0 : i32
    %c0_i32_0 = arith.constant 0 : i32
    %c0_i32_1 = arith.constant 0 : i32
    return %c0_i32, %c0_i32_0 : i32, i32
  }
  func.func @transform_3(%arg0: i32, %arg1: i32, %arg2: memref<1xf32, #tpu.memory_space<smem>>) -> (i32, i32) {
    %c0_i32 = arith.constant 0 : i32
    %c0_i32_0 = arith.constant 0 : i32
    %c0_i32_1 = arith.constant 0 : i32
    return %c0_i32, %c0_i32_0 : i32, i32
  }
  func.func @transform_4(%arg0: i32, %arg1: i32, %arg2: memref<1xf32, #tpu.memory_space<smem>>) -> (i32, i32) {
    %c0_i32 = arith.constant 0 : i32
    %c0_i32_0 = arith.constant 0 : i32
    return %arg0, %c0_i32 : i32, i32
  }
}

</mosaic_0001>

<bundles_post_ra>
// kernel: tpu_custom_call.1
= control target key start
LH: loop header
LB: loop body
LE: loop exit
PB: predicated region body
PF: predicated region fallthrough
CT: control target
= control target key end

     0   :  { %11 = vsyncpa [#allocation5], 0  ;;  %s475_s0 = inlined_call_operand.<no memory space> [shape: f32[1], index: 0, kind: input, shape index: {}]   ;;  %s476_s1 = inlined_call_operand.hbm [shape: f32[4,512], index: 1, kind: input, shape index: {}]   ;;  %s477_s2 = inlined_call_operand.hbm [shape: f32[4,512], index: 2, kind: input, shape index: {}]   ;;  %s478_s3 = inlined_call_operand.hbm [shape: f32[8,512], index: 3, kind: input, shape index: {}]   ;;  %s479_s4 = inlined_call_operand.hbm [shape: f32[8,512], index: 4, kind: input, shape index: {}]   ;;  %s480_s5 = inlined_call_operand.hbm [shape: f32[8,512], index: 5, kind: output, shape index: {}]  }
   0x1   :  { %12 = vsyncpa [#allocation8], 0 }
   0x2   :  { %13 = vsyncpa [#allocation11], 0 }
   0x3   :  { %14 = vsyncpa [#allocation6], 0  ;;  %s376_s18 = smov [#allocation7]   ;;  %s377_s20 = smov [#allocation4]  }
   0x4   :  { %s39_s19 = sshll.u32 %s376_s18, 4  ;;  %s25_s21 = sshll.u32 %s377_s20, 4  ;;  %s40_s19 = int_to_ptr.vmem [resolvable:$true] %s39_s19  ;;  %s26_s21 = int_to_ptr.vmem [resolvable:$true] %s25_s21 }
   0x5   :  { %s258_s24 = scalar_lea.hbm %s477_s2, 256 }
   0x6   :  { %p259_p0 = scmp.ne.s32.totalorder %s477_s2, %s258_s24  ;;  %p262_p1 = scmp.lt.u32.totalorder %s258_s24, %s477_s2 }
   0x8   :  { %p264_p2 = pnand %p262_p1, %p259_p0 }
   0xa   :  { %267 = shalt.err (!%p264_p2)
}
   0xb   :  { %s268_s29 = scalar_lea.vmem %s40_s19, 256  ;;  %p273_p4 = scmp.lt.s32.totalorder %s40_s19, %s40_s19 }
   0xc   :  { %p269_p3 = scmp.ne.s32.totalorder %s40_s19, %s268_s29  ;;  %p274_p5 = scmp.lt.s32.totalorder %s268_s29, %s268_s29 }
   0xe   :  { %p275_p6 = por %p274_p5, %p273_p4 }
  0x10   :  { %p276_p7 = pnand %p275_p6, %p269_p3 }
  0x12   :  { %279 = shalt.err (!%p276_p7)
}
  0x13   :  { %42 = dma.hbm_to_vmem [thread:$0]  %s477_s2, 256, %s40_s19, [#allocation8]  }
  0x14   :  { %s280_s9 = scalar_lea.hbm %s476_s1, 256 }
  0x15   :  { %p281_p8 = scmp.ne.s32.totalorder %s476_s1, %s280_s9  ;;  %p284_p9 = scmp.lt.u32.totalorder %s280_s9, %s476_s1 }
  0x17   :  { %p286_p10 = pnand %p284_p9, %p281_p8 }
  0x19   :  { %289 = shalt.err (!%p286_p10)
}
  0x1a   :  { %s290_s14 = scalar_lea.vmem %s26_s21, 256  ;;  %p295_p12 = scmp.lt.s32.totalorder %s26_s21, %s26_s21 }
  0x1b   :  { %p291_p11 = scmp.ne.s32.totalorder %s26_s21, %s290_s14  ;;  %p296_p13 = scmp.lt.s32.totalorder %s290_s14, %s290_s14 }
  0x1d   :  { %p297_p0 = por %p296_p13, %p295_p12 }
  0x1f   :  { %p298_p1 = pnand %p297_p0, %p291_p11 }
  0x21   :  { %301 = shalt.err (!%p298_p1)
}
  0x22   :  { %28 = dma.hbm_to_vmem [thread:$0]  %s476_s1, 256, %s26_s21, [#allocation5]  }
  0x23   :  { %s378_s16 = smov [#allocation9]   ;;  %s379_s18 = smov [#allocation10]  }
  0x24   :  { %s49_s17 = sshll.u32 %s378_s16, 4  ;;  %s59_s19 = sshll.u32 %s379_s18, 4  ;;  %s50_s17 = int_to_ptr.vmem [resolvable:$true] %s49_s17  ;;  %s60_s19 = int_to_ptr.vmem [resolvable:$true] %s59_s19 }
  0x25   :  { %s302_s23 = scalar_lea.hbm %s478_s3, 512 }
  0x26   :  { %p303_p2 = scmp.ne.s32.totalorder %s478_s3, %s302_s23  ;;  %p306_p3 = scmp.lt.u32.totalorder %s302_s23, %s478_s3 }
  0x28   :  { %p308_p4 = pnand %p306_p3, %p303_p2 }
  0x2a   :  { %311 = shalt.err (!%p308_p4)
}
  0x2b   :  { %s312_s1 = scalar_lea.vmem %s50_s17, 512  ;;  %p317_p6 = scmp.lt.s32.totalorder %s50_s17, %s50_s17 }
  0x2c   :  { %p313_p5 = scmp.ne.s32.totalorder %s50_s17, %s312_s1  ;;  %p318_p7 = scmp.lt.s32.totalorder %s312_s1, %s312_s1 }
  0x2e   :  { %p319_p8 = por %p318_p7, %p317_p6 }
  0x30   :  { %p320_p9 = pnand %p319_p8, %p313_p5 }
  0x32   :  { %323 = shalt.err (!%p320_p9)
}
  0x33   :  { %52 = dma.hbm_to_vmem [thread:$0]  %s478_s3, 512, %s50_s17, [#allocation8]  }
  0x34   :  { %s324_s6 = scalar_lea.hbm %s479_s4, 512 }
  0x35   :  { %p325_p10 = scmp.ne.s32.totalorder %s479_s4, %s324_s6  ;;  %p328_p11 = scmp.lt.u32.totalorder %s324_s6, %s479_s4 }
  0x37   :  { %p330_p12 = pnand %p328_p11, %p325_p10 }
  0x39   :  { %333 = shalt.err (!%p330_p12)
}
  0x3a   :  { %s334_s11 = scalar_lea.vmem %s60_s19, 512  ;;  %p339_p0 = scmp.lt.s32.totalorder %s60_s19, %s60_s19 }
  0x3b   :  { %p335_p13 = scmp.ne.s32.totalorder %s60_s19, %s334_s11  ;;  %p340_p1 = scmp.lt.s32.totalorder %s334_s11, %s334_s11 }
  0x3d   :  { %p341_p2 = por %p340_p1, %p339_p0 }
  0x3f   :  { %p342_p3 = pnand %p341_p2, %p335_p13 }
  0x41   :  { %345 = shalt.err (!%p342_p3)
}
  0x42   :  { %62 = dma.hbm_to_vmem [thread:$0]  %s479_s4, 512, %s60_s19, [#allocation11]  }
  0x43   :  { %368 = dma.done.wait [#allocation5], 256  }
  0x44   :  { %369 = vsyncadd [#allocation5], 4294967040 }
  0x45   :  { %370 = dma.done.wait [#allocation8], 768  }
  0x46   :  { %371 = vsyncadd [#allocation8], 4294966528 }
  0x47   :  { %372 = dma.done.wait [#allocation11], 512  }
  0x48   :  { %373 = vsyncadd [#allocation11], 4294966784  ;;  %v90_v0 = vld [vmem:[#allocation9] sm:$0xff]  ;;  %v91_v2 = vld [vmem:[#allocation9 + $0x8] sm:$0xff]  ;;  %v115_v7 = vstv %s475_s0  ;;  %vm161_vm0 = vcmask 1043456   ;;  %v199_v63 = vlaneseq  ;;  %s381_s0 = smov [#allocation12]  }
  0x49   :  { %v94_v1 = vld [vmem:[#allocation10] sm:$0xff]  ;;  %v95_v4 = vld [vmem:[#allocation10 + $0x8] sm:$0xff]  ;;  %v92_v5 = vld [vmem:[#allocation9 + $0x10] sm:$0xff]  ;;  %v380_v61 = vmov 1966171168   ;;  %s232_s4 = sshll.u32 %s381_s0, 4  ;;  %s233_s4 = int_to_ptr.vmem [resolvable:$true] %s232_s4 }
  0x4a   :  { %v98_v3 = vsub.f32 %v90_v0, %v94_v1  ;;  %v96_v6 = vld [vmem:[#allocation10 + $0x10] sm:$0xff]  ;;  %v99_v8 = vsub.f32 %v91_v2, %v95_v4  ;;  %v93_v10 = vld [vmem:[#allocation9 + $0x18] sm:$0xff]  ;;  %v128_v36 = vld [vmem:[#allocation4] sm:$0xff]  ;;  %v197_v62 = vunpack.c.l.s4 %v380_v61  ;;  %vm222_vm1 = vcmp.lt.s32.totalorder %v199_v63, 512  ;;  %s346_s2 = scalar_lea.vmem %s233_s4, 512  ;;  %p351_p5 = scmp.lt.s32.totalorder %s233_s4, %s233_s4 }
  0x4b   :  { %v100_v9 = vsub.f32 %v92_v5, %v96_v6  ;;  %v97_v11 = vld [vmem:[#allocation10 + $0x18] sm:$0xff]  ;;  %v130_v14 = vld [vmem:[#allocation7] sm:$0xff]  ;;  %v129_v38 = vld [vmem:[#allocation4 + $0x8] sm:$0xff]  ;;  %p347_p4 = scmp.ne.s32.totalorder %s233_s4, %s346_s2  ;;  %p352_p6 = scmp.lt.s32.totalorder %s346_s2, %s346_s2 }
  0x4c   :  { %v102_v12 = vmul.f32 %v98_v3, %v98_v3  ;;  %v101_v13 = vsub.f32 %v93_v10, %v97_v11  ;;  %v131_v15 = vld [vmem:[#allocation7 + $0x8] sm:$0xff]  ;;  %v103_v16 = vmul.f32 %v99_v8, %v99_v8  ;;  %250 = vlog2.f32 %v130_v14 }
  0x4d   :  { %v104_v17 = vmul.f32 %v100_v9, %v100_v9  ;;  %v138_v18 = vsub.f32 1.0, %v130_v14  ;;  %252 = vlog2.f32 %v131_v15  ;;  %v139_v21 = vsub.f32 1.0, %v131_v15  ;;  %p353_p7 = por %p352_p6, %p351_p5 }
  0x4e   :  { %v116_v19 = vmul.f32 %v115_v7, %v102_v12  ;;  %v105_v20 = vmul.f32 %v101_v13, %v101_v13  ;;  %v117_v22 = vmul.f32 %v115_v7, %v103_v16  ;;  %v198_v8 = vunpack.c.0.s8 %v197_v62 }
  0x4f   :  { %v118_v23 = vmul.f32 %v115_v7, %v104_v17  ;;  %254 = vlog2.f32 %v138_v18  ;;  %v200_v9 = vshrl.u32 %v199_v63, 7  ;;  %p354_p8 = pnand %p353_p7, %p347_p4 }
  0x50   :  { %v119_v24 = vmul.f32 %v115_v7, %v105_v20  ;;  %256 = vlog2.f32 %v139_v21  ;;  %124 = vst [vmem:[#allocation12] sm:$0xff] %v116_v19  ;;  %125 = vst [vmem:[#allocation12 + $0x8] sm:$0xff] %v117_v22 }
  0x51   :  { %126 = vst [vmem:[#allocation12 + $0x10] sm:$0xff] %v118_v23  ;;  %v201_v17 = vsub.s32 %v198_v8, %v200_v9 }
  0x52   :  { %127 = vst [vmem:[#allocation12 + $0x18] sm:$0xff] %v119_v24 }
  0x56   :  { %v251_v25 = vpop.eup %250 }
  0x57   :  { %v253_v26 = vpop.eup %252  ;;  %v133_v27 = vmul.f32 0.6931472, %v251_v25 }
  0x58   :  { %v135_v29 = vmul.f32 0.6931472, %v253_v26 }
  0x59   :  { %v255_v28 = vpop.eup %254  ;;  %v136_v31 = vmax.f32 %v133_v27, -100.0  ;;  %v154_v24 = vld [vmem:[#allocation12] ss:$8 sm:$0xf] }
  0x5a   :  { %v257_v30 = vpop.eup %256  ;;  %v141_v32 = vmul.f32 0.6931472, %v255_v28  ;;  %v137_v33 = vmax.f32 %v135_v29, -100.0 }
  0x5b   :  { %v143_v34 = vmul.f32 0.6931472, %v257_v30 }
  0x5c   :  { %v144_v35 = vmax.f32 %v141_v32, -100.0 }
  0x5d   :  { %v145_v37 = vmax.f32 %v143_v34, -100.0 }
  0x5e   :  { %v146_v39 = vsub.f32 %v136_v31, %v144_v35 }
  0x5f   :  { %v147_v40 = vsub.f32 %v137_v33, %v145_v37 }
  0x60   :  { %v148_v41 = vmul.f32 %v146_v39, %v128_v36 }
  0x61   :  { %v149_v42 = vmul.f32 %v147_v40, %v129_v38 }
  0x62   :  { %v150_v43 = vadd.f32 %v148_v41, %v144_v35 }
  0x63   :  { %v151_v44 = vadd.f32 %v149_v42, %v145_v37 }
  0x64   :  { %v152_v45 = vsub.f32 0.0, %v150_v43 }
  0x65   :  { %v153_v46 = vsub.f32 0.0, %v151_v44 }
  0x66   :  { %v157_v47 = vcombine.high %v152_v45, %v152_v45  ;;  %v162_v48 = vsel %vm161_vm0, %v152_v45, 0.0 }
  0x67   :  { %v158_v49 = vcombine.high %v153_v46, %v153_v46  ;;  %v163_v50 = vrot.slane %v162_v48, 4  ;;  %v176_v51 = vsel %vm161_vm0, %v153_v46, 0.0 }
  0x68   :  { %v169_v52 = vsel %vm161_vm0, %v157_v47, 0.0  ;;  %v177_v53 = vrot.slane %v176_v51, 4 }
  0x69   :  { %v164_v54 = vadd.f32 %v163_v50, %v162_v48  ;;  %v170_v55 = vrot.slane %v169_v52, 4  ;;  %v183_v56 = vsel %vm161_vm0, %v158_v49, 0.0 }
  0x6a   :  { %v178_v57 = vadd.f32 %v177_v53, %v176_v51  ;;  %v184_v58 = vrot.slane %v183_v56, 4 }
  0x6b   :  { %v165_v59 = vrot.slane %v164_v54, 2  ;;  %v171_v60 = vadd.f32 %v170_v55, %v169_v52 }
  0x6c   :  { %v179_v0 = vrot.slane %v178_v57, 2  ;;  %v185_v1 = vadd.f32 %v184_v58, %v183_v56 }
  0x6d   :  { %v166_v2 = vadd.f32 %v165_v59, %v164_v54  ;;  %v172_v3 = vrot.slane %v171_v60, 2 }
  0x6e   :  { %v180_v4 = vadd.f32 %v179_v0, %v178_v57  ;;  %v186_v5 = vrot.slane %v185_v1, 2 }
  0x6f   :  { %v167_v6 = vrot.slane %v166_v2, 1  ;;  %v173_v7 = vadd.f32 %v172_v3, %v171_v60 }
  0x70   :  { %v181_v10 = vrot.slane %v180_v4, 1  ;;  %v187_v11 = vadd.f32 %v186_v5, %v185_v1 }
  0x71   :  { %v168_v12 = vadd.f32 %v167_v6, %v166_v2  ;;  %v174_v13 = vrot.slane %v173_v7, 1 }
  0x72   :  { %v182_v14 = vadd.f32 %v181_v10, %v180_v4  ;;  %v188_v15 = vrot.slane %v187_v11, 1 }
  0x73   :  { %v175_v16 = vadd.f32 %v174_v13, %v173_v7 }
  0x74   :  { %v189_v18 = vadd.f32 %v188_v15, %v187_v11 }
  0x75   :  { %v194_v19 = vcombine.low %v168_v12, %v175_v16 }
  0x76   :  { %v195_v20 = vcombine.low %v182_v14, %v189_v18 }
  0x77   :  { %v202_v21 = vrot.slane %v194_v19, %v201_v17 }
  0x78   :  { %v209_v22 = vrot.slane %v195_v20, %v201_v17 }
  0x7a   :  { %v210_v23 = vcombine.low %v202_v21, %v209_v22 }
  0x7c   :  { %v217_v25 = vrot.slane %v210_v23, %v201_v17 }
  0x7e   :  { %v219_v26 = vadd.f32 %v217_v25, %v154_v24 }
  0x80   :  { %224 = vst.msk [vmem:[#allocation12] ss:$8 sm:$0xf] %vm222_vm1, %v219_v26 }
  0x81   :  { %357 = shalt.err (!%p354_p8)
}
  0x82   :  { %s358_s17 = scalar_lea.hbm %s480_s5, 512 }
  0x83   :  { %p359_p9 = scmp.ne.s32.totalorder %s480_s5, %s358_s17  ;;  %p362_p10 = scmp.lt.u32.totalorder %s358_s17, %s480_s5 }
  0x85   :  { %p364_p11 = pnand %p362_p10, %p359_p9 }
  0x87   :  { %367 = shalt.err (!%p364_p11)
}
  0x88   :  { %235 = dma.vmem_to_hbm [thread:$0]  %s233_s4, 512, %s480_s5, [#allocation6]  }
  0x89   :  { %374 = dma.done.wait [#allocation6], 512  }
  0x8a   :  { %375 = vsyncadd [#allocation6], 4294966784 }
  0x8b   :  { %239 = vsyncpa [#allocation5], 1 }
  0x8c   :  { %240 = vsyncpa [#allocation8], 1 }
  0x8d   :  { %241 = vsyncpa [#allocation11], 1 }
  0x8e   :  { %242 = vsyncpa [#allocation6], 1 }

</bundles_post_ra>
